<compile_context>
chip_gen: v5e
topology: v5e:2x2
jax: 0.10.0
libtpu: 0.0.40
codegen_flags: <defaults>
</compile_context>

<pallas_src>
import functools
import math

import jax
import jax.numpy as jnp
from jax import lax
from jax.experimental import pallas as pl
from jax.experimental.pallas import tpu as pltpu

F32 = jnp.float32
BF16 = jnp.bfloat16


def _round_up(x, m):
    return ((x + m - 1) // m) * m


def _masked_layernorm(x, gamma, beta, n_real, eps=1e-5):
    """PyTorch nn.LayerNorm (biased var, eps=1e-5) over the first `n_real` lanes of a
    lane-padded slab.  Assumes padded lanes of x / gamma / beta are zero, so padded
    output lanes stay zero."""
    lane = lax.broadcasted_iota(jnp.int32, x.shape, x.ndim - 1)
    mask = (lane < n_real).astype(x.dtype)
    inv_n = 1.0 / float(n_real)
    mu = jnp.sum(x * mask, axis=-1, keepdims=True) * inv_n
    xc = (x - mu) * mask
    var = jnp.sum(xc * xc, axis=-1, keepdims=True) * inv_n
    return xc * lax.rsqrt(var + eps) * gamma + beta


# ---------------------------------------------------------------------------
# Kernel 1: fused QKV projection, head-major bf16 outputs.
# ---------------------------------------------------------------------------
def qkv_proj_kernel(x_ref, wqkv_ref, bqkv_ref, q_ref, k_ref, v_ref,
                    *, num_heads, dim_head, scale):
    H, dh = num_heads, dim_head
    y = jnp.dot(x_ref[...].astype(BF16), wqkv_ref[...],
                preferred_element_type=F32) + bqkv_ref[...]
    # Head-major rearrangement happens once per sequence tile (not per kv step).
    for h in range(H):
        q_ref[h] = (y[:, h * dh:(h + 1) * dh] * scale).astype(q_ref.dtype)
        k_ref[h] = y[:, (H + h) * dh:(H + h + 1) * dh].astype(k_ref.dtype)
        v_ref[h] = y[:, (2 * H + h) * dh:(2 * H + h + 1) * dh].astype(v_ref.dtype)


# ---------------------------------------------------------------------------
# Kernel 2: flash attention + output projection + residual + LayerNorm1.
# ---------------------------------------------------------------------------
def attn_ln1_kernel(x_ref, q_ref, k_ref, v_ref, wo_ref, bo_ref, g1_ref, be1_ref,
                    o_ref, m_sc, l_sc, acc_sc, *, num_heads, dim_model_real):
    H = num_heads
    ki = pl.program_id(2)

    @pl.when(ki == 0)
    def _init():
        m_sc[...] = jnp.full(m_sc.shape, -jnp.inf, F32)
        l_sc[...] = jnp.zeros(l_sc.shape, F32)
        acc_sc[...] = jnp.zeros(acc_sc.shape, F32)

    # Online softmax.  Heads are a leading-dim index (free); no lane slicing here.
    for h in range(H):
        q_h = q_ref[h]                                            # (bq, dh) bf16
        k_h = k_ref[h]                                            # (bk, dh) bf16
        v_h = v_ref[h]                                            # (bk, dh) bf16
        # contract over the last dim of both operands: no k.T materialized
        s = lax.dot_general(q_h, k_h, (((1,), (1,)), ((), ())),
                            preferred_element_type=F32)           # (bq, bk)
        m_prev = m_sc[h]                                          # (bq, 1)
        m_new = jnp.maximum(m_prev, jnp.max(s, axis=-1, keepdims=True))
        alpha = jnp.exp(m_prev - m_new)
        p = jnp.exp(s - m_new)
        l_sc[h] = alpha * l_sc[h] + jnp.sum(p, axis=-1, keepdims=True)
        acc_sc[h] = alpha * acc_sc[h] + jnp.dot(p.astype(BF16), v_h,
                                                preferred_element_type=F32)
        m_sc[h] = m_new

    @pl.when(ki == pl.num_programs(2) - 1)
    def _finalize():
        inv_l = pl.reciprocal(l_sc[...], approx=True)             # EUP, not VALU
        # One-time lane concat of normalized heads, then a single wide MXU matmul.
        attn_in = jnp.concatenate(
            [acc_sc[h] * inv_l[h] for h in range(H)], axis=-1)    # (bq, H*dh)
        attn = jnp.dot(attn_in.astype(BF16), wo_ref[...],
                       preferred_element_type=F32) + bo_ref[...]  # (bq, Dp)
        x1 = _masked_layernorm(x_ref[...].astype(F32) + attn,
                               g1_ref[...], be1_ref[...], dim_model_real)
        o_ref[...] = x1.astype(o_ref.dtype)


# ---------------------------------------------------------------------------
# Kernel 3: FeedForward (dim_ff streamed in chunks) + residual + LayerNorm2.
# ---------------------------------------------------------------------------
def ffn_ln2_kernel(x1_ref, w1_ref, b1_ref, w2_ref, b2_ref, g2_ref, be2_ref,
                   o_ref, acc_sc, *, dim_model_real):
    fi = pl.program_id(2)

    @pl.when(fi == 0)
    def _init():
        acc_sc[...] = jnp.zeros(acc_sc.shape, F32)

    x1 = x1_ref[...].astype(F32)
    hid = jnp.dot(x1.astype(BF16), w1_ref[...],
                  preferred_element_type=F32) + b1_ref[...]       # (bs, block_f)
    hid = jnp.maximum(hid, 0.0)
    acc_sc[...] += jnp.dot(hid.astype(BF16), w2_ref[...],
                           preferred_element_type=F32)            # (bs, Dp)

    @pl.when(fi == pl.num_programs(2) - 1)
    def _finalize():
        ff = acc_sc[...] + b2_ref[...]
        o_ref[...] = _masked_layernorm(x1 + ff, g2_ref[...], be2_ref[...],
                                       dim_model_real).astype(o_ref.dtype)


# ---------------------------------------------------------------------------
# Host-side helpers.
# ---------------------------------------------------------------------------
def _buf_bytes(shape, dtype):
    """Approximate VMEM bytes of one buffer after (8,128) tiling of the last 2 dims."""
    if len(shape) == 0:
        n = 1
    elif len(shape) == 1:
        n = _round_up(int(shape[0]), 128)
    else:
        n = 1
        for d in shape[:-2]:
            n *= int(d)
        n *= _round_up(int(shape[-2]), 8) * _round_up(int(shape[-1]), 128)
    return n * jnp.dtype(dtype).itemsize


def _vmem_limit_bytes(working_set_bytes):
    """Cap the VMEM request against the real per-core capacity (64 MiB on v7x,
    128 MiB on v5e/v6e), leaving ~16 MiB compiler headroom."""
    cap = 128 << 20
    get_info = getattr(pltpu, "get_tpu_info", None)
    if get_info is not None:
        try:
            cap = int(getattr(get_info(), "vmem_capacity_bytes", cap))
        except Exception:
            pass
    headroom = 16 << 20
    return int(max(min(working_set_bytes + headroom, cap - headroom), 32 << 20))


def encoder_layer_pallas(x, params, *, num_heads, dim_head,
                         block_q=None, block_kv=None, block_s=None, block_f=None):
    B, S, D = x.shape
    H, dh = num_heads, dim_head
    HD = H * dh
    Dp = _round_up(D, 128)
    F = params["w1"].shape[1]
    Fp = _round_up(F, 128)

    # Tile defaults.  Re-derive per generation: v6e -> block_q>=256 / block_kv=512,
    # v5e -> larger (512/1024, 128 MiB VMEM, slower HBM), v7x -> size against 64 MiB.
    if block_q is None:
        block_q = min(S, 256)
    if block_kv is None:
        block_kv = min(S, 512)
    if block_s is None:
        block_s = min(S, 256)
    if block_f is None:
        block_f = min(Fp, 512)
    assert S % block_q == 0 and S % block_kv == 0 and S % block_s == 0
    assert Fp % block_f == 0

    def pad2(a, rows, cols):
        r, c = a.shape
        return jnp.pad(a, ((0, rows - r), (0, cols - c)))

    def heads_to_cols(w):   # (H, D, dh) -> (D, H*dh)
        return jnp.transpose(w, (1, 0, 2)).reshape(D, HD)

    def bias_to_cols(b):    # (H, 1, dh) -> (1, H*dh)
        return jnp.transpose(b, (1, 0, 2)).reshape(1, HD)

    # Fused / padded weights (padded rows & columns are zero, so padded lanes of
    # every intermediate stay exactly zero -> LayerNorm stays exact).
    wqkv = pad2(jnp.concatenate([heads_to_cols(params["wq"]),
                                 heads_to_cols(params["wk"]),
                                 heads_to_cols(params["wv"])], axis=1),
                Dp, 3 * HD).astype(BF16)
    bqkv = jnp.concatenate([bias_to_cols(params["bq"]),
                            bias_to_cols(params["bk"]),
                            bias_to_cols(params["bv"])], axis=1).astype(F32)
    wo_p = pad2(params["wo"], HD, Dp).astype(BF16)
    bo_p = pad2(params["bo"], 1, Dp).astype(F32)
    g1_p = pad2(params["g1"], 1, Dp).astype(F32)
    be1_p = pad2(params["be1"], 1, Dp).astype(F32)
    w1_p = pad2(params["w1"], Dp, Fp).astype(BF16)
    b1_p = pad2(params["b1"], 1, Fp).astype(F32)
    w2_p = pad2(params["w2"], Fp, Dp).astype(BF16)
    b2_p = pad2(params["b2"], 1, Dp).astype(F32)
    g2_p = pad2(params["g2"], 1, Dp).astype(F32)
    be2_p = pad2(params["be2"], 1, Dp).astype(F32)

    xp = jnp.pad(x.astype(F32), ((0, 0), (0, 0), (0, Dp - D)))

    # Rough VMEM working set (double-buffered blocks + scratch), with (8,128) padding
    # included so the small-lane scratch is not under-counted.
    weight_shapes = [
        (wqkv.shape, BF16), (bqkv.shape, F32), (wo_p.shape, BF16), (bo_p.shape, F32),
        (g1_p.shape, F32), (be1_p.shape, F32), ((Dp, block_f), BF16),
        ((1, block_f), F32), ((block_f, Dp), BF16), (b2_p.shape, F32),
        (g2_p.shape, F32), (be2_p.shape, F32),
    ]
    act_shapes = [
        ((block_q, Dp), F32), ((H, block_q, dh), BF16),
        ((H, block_kv, dh), BF16), ((H, block_kv, dh), BF16),
        ((block_q, Dp), F32), ((block_s, Dp), F32), ((block_s, Dp), F32),
    ]
    scratch_est = [
        ((H, block_q, 1), F32), ((H, block_q, 1), F32), ((H, block_q, dh), F32),
        ((block_s, Dp), F32),
    ]
    working = (2 * sum(_buf_bytes(s, d) for s, d in weight_shapes)
               + 2 * sum(_buf_bytes(s, d) for s, d in act_shapes)
               + sum(_buf_bytes(s, d) for s, d in scratch_est))
    vmem_limit = _vmem_limit_bytes(working)

    scale = 1.0 / math.sqrt(dh)

    # ---- Call 1: QKV projection (head-major, computed once per token) ------
    q, k, v = pl.pallas_call(
        functools.partial(qkv_proj_kernel, num_heads=H, dim_head=dh, scale=scale),
        out_shape=(jax.ShapeDtypeStruct((B, H, S, dh), BF16),
                   jax.ShapeDtypeStruct((B, H, S, dh), BF16),
                   jax.ShapeDtypeStruct((B, H, S, dh), BF16)),
        grid_spec=pltpu.PrefetchScalarGridSpec(
            num_scalar_prefetch=0,
            grid=(B, S // block_s),
            in_specs=[
                pl.BlockSpec((None, block_s, Dp), lambda b, si: (b, si, 0)),
                pl.BlockSpec(wqkv.shape, lambda b, si: (0, 0)),
                pl.BlockSpec(bqkv.shape, lambda b, si: (0, 0)),
            ],
            out_specs=[
                pl.BlockSpec((None, H, block_s, dh), lambda b, si: (b, 0, si, 0)),
                pl.BlockSpec((None, H, block_s, dh), lambda b, si: (b, 0, si, 0)),
                pl.BlockSpec((None, H, block_s, dh), lambda b, si: (b, 0, si, 0)),
            ],
        ),
        compiler_params=pltpu.CompilerParams(
            dimension_semantics=("parallel", "parallel"),
            vmem_limit_bytes=vmem_limit),
    )(xp, wqkv, bqkv)

    # ---- Call 2: flash attention + out-proj + residual + LayerNorm1 --------
    # B * (S // block_q) parallel steps feed both v7x TensorCores; kv innermost.
    x1 = pl.pallas_call(
        functools.partial(attn_ln1_kernel, num_heads=H, dim_model_real=D),
        out_shape=jax.ShapeDtypeStruct((B, S, Dp), F32),
        grid_spec=pltpu.PrefetchScalarGridSpec(
            num_scalar_prefetch=0,
            grid=(B, S // block_q, S // block_kv),
            in_specs=[
                pl.BlockSpec((None, block_q, Dp), lambda b, qi, ki: (b, qi, 0)),
                pl.BlockSpec((None, H, block_q, dh), lambda b, qi, ki: (b, 0, qi, 0)),
                pl.BlockSpec((None, H, block_kv, dh), lambda b, qi, ki: (b, 0, ki, 0)),
                pl.BlockSpec((None, H, block_kv, dh), lambda b, qi, ki: (b, 0, ki, 0)),
                pl.BlockSpec(wo_p.shape, lambda b, qi, ki: (0, 0)),
                pl.BlockSpec(bo_p.shape, lambda b, qi, ki: (0, 0)),
                pl.BlockSpec(g1_p.shape, lambda b, qi, ki: (0, 0)),
                pl.BlockSpec(be1_p.shape, lambda b, qi, ki: (0, 0)),
            ],
            out_specs=pl.BlockSpec((None, block_q, Dp), lambda b, qi, ki: (b, qi, 0)),
            scratch_shapes=[
                pltpu.VMEM((H, block_q, 1), F32),     # running max
                pltpu.VMEM((H, block_q, 1), F32),     # running denom
                pltpu.VMEM((H, block_q, dh), F32),    # running P@V
            ],
        ),
        compiler_params=pltpu.CompilerParams(
            dimension_semantics=("parallel", "parallel", "arbitrary"),
            vmem_limit_bytes=vmem_limit),
    )(xp, q, k, v, wo_p, bo_p, g1_p, be1_p)

    # ---- Call 3: FFN (dim_ff streamed) + residual + LayerNorm2 -------------
    out_p = pl.pallas_call(
        functools.partial(ffn_ln2_kernel, dim_model_real=D),
        out_shape=jax.ShapeDtypeStruct((B, S, Dp), x.dtype),
        grid_spec=pltpu.PrefetchScalarGridSpec(
            num_scalar_prefetch=0,
            grid=(B, S // block_s, Fp // block_f),
            in_specs=[
                pl.BlockSpec((None, block_s, Dp), lambda b, si, fi: (b, si, 0)),
                pl.BlockSpec((Dp, block_f), lambda b, si, fi: (0, fi)),
                pl.BlockSpec((1, block_f), lambda b, si, fi: (0, fi)),
                pl.BlockSpec((block_f, Dp), lambda b, si, fi: (fi, 0)),
                pl.BlockSpec(b2_p.shape, lambda b, si, fi: (0, 0)),
                pl.BlockSpec(g2_p.shape, lambda b, si, fi: (0, 0)),
                pl.BlockSpec(be2_p.shape, lambda b, si, fi: (0, 0)),
            ],
            out_specs=pl.BlockSpec((None, block_s, Dp), lambda b, si, fi: (b, si, 0)),
            scratch_shapes=[pltpu.VMEM((block_s, Dp), F32)],
        ),
        compiler_params=pltpu.CompilerParams(
            dimension_semantics=("parallel", "parallel", "arbitrary"),
            vmem_limit_bytes=vmem_limit),
    )(x1, w1_p, b1_p, w2_p, b2_p, g2_p, be2_p)

    return out_p[..., :D]


# ---------------------------------------------------------------------------
# Pure-JAX f32 reference mirroring the PyTorch forward (eval mode).
# ---------------------------------------------------------------------------
def _layernorm_ref(x, gamma, beta, eps=1e-5):
    mu = jnp.mean(x, axis=-1, keepdims=True)
    var = jnp.mean((x - mu) ** 2, axis=-1, keepdims=True)
    return (x - mu) * lax.rsqrt(var + eps) * gamma + beta


def encoder_layer_ref(x, params, *, num_heads, dim_q):
    scale = 1.0 / math.sqrt(dim_q)
    heads = []
    for h in range(num_heads):
        q = x @ params["wq"][h] + params["bq"][h]
        k = x @ params["wk"][h] + params["bk"][h]
        v = x @ params["wv"][h] + params["bv"][h]
        s = jnp.einsum("bqd,bkd->bqk", q, k) * scale
        p = jax.nn.softmax(s, axis=-1)
        heads.append(jnp.einsum("bqk,bkd->bqd", p, v))
    attn = jnp.concatenate(heads, axis=-1) @ params["wo"] + params["bo"]
    x1 = _layernorm_ref(x + attn, params["g1"], params["be1"])
    ff = jnp.maximum(x1 @ params["w1"] + params["b1"], 0.0) @ params["w2"] + params["b2"]
    return _layernorm_ref(x1 + ff, params["g2"], params["be2"])


def init_params(key, dim_model, num_heads, dim_q, dim_k, dim_ff):
    ks = jax.random.split(key, 8)
    sd = 0.05
    return {
        "wq": jax.random.normal(ks[0], (num_heads, dim_model, dim_q), F32) * sd,
        "bq": jax.random.normal(ks[1], (num_heads, 1, dim_q), F32) * sd,
        "wk": jax.random.normal(ks[2], (num_heads, dim_model, dim_k), F32) * sd,
        "bk": jax.random.normal(ks[3], (num_heads, 1, dim_k), F32) * sd,
        "wv": jax.random.normal(ks[4], (num_heads, dim_model, dim_k), F32) * sd,
        "bv": jax.random.normal(ks[5], (num_heads, 1, dim_k), F32) * sd,
        "wo": jax.random.normal(ks[6], (num_heads * dim_k, dim_model), F32) * sd,
        "bo": jnp.zeros((1, dim_model), F32),
        "g1": jnp.ones((1, dim_model), F32),
        "be1": jnp.zeros((1, dim_model), F32),
        "w1": jax.random.normal(ks[7], (dim_model, dim_ff), F32) * sd,
        "b1": jnp.zeros((1, dim_ff), F32),
        "w2": jax.random.normal(jax.random.fold_in(key, 99), (dim_ff, dim_model), F32) * sd,
        "b2": jnp.zeros((1, dim_model), F32),
        "g2": jnp.ones((1, dim_model), F32),
        "be2": jnp.zeros((1, dim_model), F32),
    }


if __name__ == "__main__":
    # Small shapes consistent with the module: dim_q = dim_k = dim_model // num_heads.
    B, S = 2, 8
    dim_model, num_heads, dim_ff = 32, 4, 64
    dim_q = dim_k = max(dim_model // num_heads, 1)

    key = jax.random.PRNGKey(0)
    kx, kp = jax.random.split(key)
    src = jax.random.normal(kx, (B, S, dim_model), F32)
    params = init_params(kp, dim_model, num_heads, dim_q, dim_k, dim_ff)

    out = encoder_layer_pallas(src, params, num_heads=num_heads, dim_head=dim_q)
    out = jax.block_until_ready(out)

    ref = encoder_layer_ref(src, params, num_heads=num_heads, dim_q=dim_q)
    assert out.shape == (B, S, dim_model)
    # bf16 MXU operands with f32 accumulation -> slightly looser tolerance vs f32 ref
    assert jnp.allclose(out, ref, rtol=2e-2, atol=2e-2), "mismatch vs JAX reference"

    print("KERNEL_OK")
</pallas_src>

<mosaic_0001>
module attributes {stable_mosaic.version = 11 : i64} {
  func.func @qkv_proj_kernel(%arg0: i32, %arg1: i32, %arg2: memref<1x8x128xf32, #tpu.memory_space<vmem>>, %arg3: memref<128x96xbf16, #tpu.memory_space<vmem>>, %arg4: memref<1x96xf32, #tpu.memory_space<vmem>>, %arg5: memref<1x4x8x8xbf16, #tpu.memory_space<vmem>>, %arg6: memref<1x4x8x8xbf16, #tpu.memory_space<vmem>>, %arg7: memref<1x4x8x8xbf16, #tpu.memory_space<vmem>>) attributes {dimension_semantics = [#tpu.dimension_semantics<parallel>, #tpu.dimension_semantics<parallel>], iteration_bounds = array<i64: 2, 1>, scalar_prefetch = 0 : i64, scratch_operands = 0 : i64, tpu.core_type = #tpu.core_type<tc>, window_params = [{transform_indices = @transform_0, window_bounds = array<i64: 1, 8, 128>}, {pipeline_mode = #tpu.pipeline_mode<synchronous>, transform_indices = @transform_1, window_bounds = array<i64: 128, 96>}, {pipeline_mode = #tpu.pipeline_mode<synchronous>, transform_indices = @transform_2, window_bounds = array<i64: 1, 96>}, {transform_indices = @transform_3, window_bounds = array<i64: 1, 4, 8, 8>}, {transform_indices = @transform_4, window_bounds = array<i64: 1, 4, 8, 8>}, {transform_indices = @transform_5, window_bounds = array<i64: 1, 4, 8, 8>}]} {
    %c0 = arith.constant 0 : index
    %c0_0 = arith.constant 0 : index
    %c0_1 = arith.constant 0 : index
    %0 = vector.load %arg2[%c0, %c0_0, %c0_1] : memref<1x8x128xf32, #tpu.memory_space<vmem>>, vector<1x8x128xf32>
    %1 = vector.shape_cast %0 : vector<1x8x128xf32> to vector<8x128xf32>
    %2 = arith.truncf %1 : vector<8x128xf32> to vector<8x128xbf16>
    %c0_2 = arith.constant 0 : index
    %c0_3 = arith.constant 0 : index
    %3 = vector.load %arg3[%c0_2, %c0_3] : memref<128x96xbf16, #tpu.memory_space<vmem>>, vector<128x96xbf16>
    %cst = arith.constant dense<0.000000e+00> : vector<8x96xf32>
    %4 = tpu.matmul %2, %3, %cst {dimension_numbers = #tpu.dot_dimension_numbers<[1], [0], [0], [1], [0, 0, 1, 1], [], []>} : vector<8x128xbf16>, vector<128x96xbf16>, vector<8x96xf32> -> vector<8x96xf32>
    %c0_4 = arith.constant 0 : index
    %c0_5 = arith.constant 0 : index
    %5 = vector.load %arg4[%c0_4, %c0_5] : memref<1x96xf32, #tpu.memory_space<vmem>>, vector<1x96xf32>
    %6 = vector.broadcast %5 : vector<1x96xf32> to vector<8x96xf32>
    %7 = arith.addf %4, %6 : vector<8x96xf32>
    %8 = vector.extract_strided_slice %7 {offsets = [0, 0], sizes = [8, 8], strides = [1, 1]} : vector<8x96xf32> to vector<8x8xf32>
    %cst_6 = arith.constant 0.353553385 : f32
    %9 = vector.broadcast %cst_6 : f32 to vector<8x8xf32>
    %10 = arith.mulf %8, %9 : vector<8x8xf32>
    %11 = arith.truncf %10 : vector<8x8xf32> to vector<8x8xbf16>
    %c0_7 = arith.constant 0 : index
    %c0_8 = arith.constant 0 : index
    %c0_9 = arith.constant 0 : index
    %c0_10 = arith.constant 0 : index
    %12 = vector.load %arg5[%c0_7, %c0_8, %c0_9, %c0_10] : memref<1x4x8x8xbf16, #tpu.memory_space<vmem>>, vector<1x1x8x8xbf16>
    %13 = vector.shape_cast %12 : vector<1x1x8x8xbf16> to vector<8x8xbf16>
    %14 = vector.shape_cast %11 : vector<8x8xbf16> to vector<1x1x8x8xbf16>
    tpu.vector_store %arg5[%c0_7, %c0_8, %c0_9, %c0_10], %14 {strides = array<i32>} : memref<1x4x8x8xbf16, #tpu.memory_space<vmem>>, vector<1x1x8x8xbf16>,
    %15 = vector.extract_strided_slice %7 {offsets = [0, 32], sizes = [8, 8], strides = [1, 1]} : vector<8x96xf32> to vector<8x8xf32>
    %16 = arith.truncf %15 : vector<8x8xf32> to vector<8x8xbf16>
    %c0_11 = arith.constant 0 : index
    %c0_12 = arith.constant 0 : index
    %c0_13 = arith.constant 0 : index
    %c0_14 = arith.constant 0 : index
    %17 = vector.load %arg6[%c0_11, %c0_12, %c0_13, %c0_14] : memref<1x4x8x8xbf16, #tpu.memory_space<vmem>>, vector<1x1x8x8xbf16>
    %18 = vector.shape_cast %17 : vector<1x1x8x8xbf16> to vector<8x8xbf16>
    %19 = vector.shape_cast %16 : vector<8x8xbf16> to vector<1x1x8x8xbf16>
    tpu.vector_store %arg6[%c0_11, %c0_12, %c0_13, %c0_14], %19 {strides = array<i32>} : memref<1x4x8x8xbf16, #tpu.memory_space<vmem>>, vector<1x1x8x8xbf16>,
    %20 = vector.extract_strided_slice %7 {offsets = [0, 64], sizes = [8, 8], strides = [1, 1]} : vector<8x96xf32> to vector<8x8xf32>
    %21 = arith.truncf %20 : vector<8x8xf32> to vector<8x8xbf16>
    %c0_15 = arith.constant 0 : index
    %c0_16 = arith.constant 0 : index
    %c0_17 = arith.constant 0 : index
    %c0_18 = arith.constant 0 : index
    %22 = vector.load %arg7[%c0_15, %c0_16, %c0_17, %c0_18] : memref<1x4x8x8xbf16, #tpu.memory_space<vmem>>, vector<1x1x8x8xbf16>
    %23 = vector.shape_cast %22 : vector<1x1x8x8xbf16> to vector<8x8xbf16>
    %24 = vector.shape_cast %21 : vector<8x8xbf16> to vector<1x1x8x8xbf16>
    tpu.vector_store %arg7[%c0_15, %c0_16, %c0_17, %c0_18], %24 {strides = array<i32>} : memref<1x4x8x8xbf16, #tpu.memory_space<vmem>>, vector<1x1x8x8xbf16>,
    %25 = vector.extract_strided_slice %7 {offsets = [0, 8], sizes = [8, 8], strides = [1, 1]} : vector<8x96xf32> to vector<8x8xf32>
    %cst_19 = arith.constant 0.353553385 : f32
    %26 = vector.broadcast %cst_19 : f32 to vector<8x8xf32>
    %27 = arith.mulf %25, %26 : vector<8x8xf32>
    %28 = arith.truncf %27 : vector<8x8xf32> to vector<8x8xbf16>
    %c0_20 = arith.constant 0 : index
    %c1 = arith.constant 1 : index
    %c0_21 = arith.constant 0 : index
    %c0_22 = arith.constant 0 : index
    %29 = vector.load %arg5[%c0_20, %c1, %c0_21, %c0_22] : memref<1x4x8x8xbf16, #tpu.memory_space<vmem>>, vector<1x1x8x8xbf16>
    %30 = vector.shape_cast %29 : vector<1x1x8x8xbf16> to vector<8x8xbf16>
    %31 = vector.shape_cast %28 : vector<8x8xbf16> to vector<1x1x8x8xbf16>
    tpu.vector_store %arg5[%c0_20, %c1, %c0_21, %c0_22], %31 {strides = array<i32>} : memref<1x4x8x8xbf16, #tpu.memory_space<vmem>>, vector<1x1x8x8xbf16>,
    %32 = vector.extract_strided_slice %7 {offsets = [0, 40], sizes = [8, 8], strides = [1, 1]} : vector<8x96xf32> to vector<8x8xf32>
    %33 = arith.truncf %32 : vector<8x8xf32> to vector<8x8xbf16>
    %c0_23 = arith.constant 0 : index
    %c1_24 = arith.constant 1 : index
    %c0_25 = arith.constant 0 : index
    %c0_26 = arith.constant 0 : index
    %34 = vector.load %arg6[%c0_23, %c1_24, %c0_25, %c0_26] : memref<1x4x8x8xbf16, #tpu.memory_space<vmem>>, vector<1x1x8x8xbf16>
    %35 = vector.shape_cast %34 : vector<1x1x8x8xbf16> to vector<8x8xbf16>
    %36 = vector.shape_cast %33 : vector<8x8xbf16> to vector<1x1x8x8xbf16>
    tpu.vector_store %arg6[%c0_23, %c1_24, %c0_25, %c0_26], %36 {strides = array<i32>} : memref<1x4x8x8xbf16, #tpu.memory_space<vmem>>, vector<1x1x8x8xbf16>,
    %37 = vector.extract_strided_slice %7 {offsets = [0, 72], sizes = [8, 8], strides = [1, 1]} : vector<8x96xf32> to vector<8x8xf32>
    %38 = arith.truncf %37 : vector<8x8xf32> to vector<8x8xbf16>
    %c0_27 = arith.constant 0 : index
    %c1_28 = arith.constant 1 : index
    %c0_29 = arith.constant 0 : index
    %c0_30 = arith.constant 0 : index
    %39 = vector.load %arg7[%c0_27, %c1_28, %c0_29, %c0_30] : memref<1x4x8x8xbf16, #tpu.memory_space<vmem>>, vector<1x1x8x8xbf16>
    %40 = vector.shape_cast %39 : vector<1x1x8x8xbf16> to vector<8x8xbf16>
    %41 = vector.shape_cast %38 : vector<8x8xbf16> to vector<1x1x8x8xbf16>
    tpu.vector_store %arg7[%c0_27, %c1_28, %c0_29, %c0_30], %41 {strides = array<i32>} : memref<1x4x8x8xbf16, #tpu.memory_space<vmem>>, vector<1x1x8x8xbf16>,
    %42 = vector.extract_strided_slice %7 {offsets = [0, 16], sizes = [8, 8], strides = [1, 1]} : vector<8x96xf32> to vector<8x8xf32>
    %cst_31 = arith.constant 0.353553385 : f32
    %43 = vector.broadcast %cst_31 : f32 to vector<8x8xf32>
    %44 = arith.mulf %42, %43 : vector<8x8xf32>
    %45 = arith.truncf %44 : vector<8x8xf32> to vector<8x8xbf16>
    %c0_32 = arith.constant 0 : index
    %c2 = arith.constant 2 : index
    %c0_33 = arith.constant 0 : index
    %c0_34 = arith.constant 0 : index
    %46 = vector.load %arg5[%c0_32, %c2, %c0_33, %c0_34] : memref<1x4x8x8xbf16, #tpu.memory_space<vmem>>, vector<1x1x8x8xbf16>
    %47 = vector.shape_cast %46 : vector<1x1x8x8xbf16> to vector<8x8xbf16>
    %48 = vector.shape_cast %45 : vector<8x8xbf16> to vector<1x1x8x8xbf16>
    tpu.vector_store %arg5[%c0_32, %c2, %c0_33, %c0_34], %48 {strides = array<i32>} : memref<1x4x8x8xbf16, #tpu.memory_space<vmem>>, vector<1x1x8x8xbf16>,
    %49 = vector.extract_strided_slice %7 {offsets = [0, 48], sizes = [8, 8], strides = [1, 1]} : vector<8x96xf32> to vector<8x8xf32>
    %50 = arith.truncf %49 : vector<8x8xf32> to vector<8x8xbf16>
    %c0_35 = arith.constant 0 : index
    %c2_36 = arith.constant 2 : index
    %c0_37 = arith.constant 0 : index
    %c0_38 = arith.constant 0 : index
    %51 = vector.load %arg6[%c0_35, %c2_36, %c0_37, %c0_38] : memref<1x4x8x8xbf16, #tpu.memory_space<vmem>>, vector<1x1x8x8xbf16>
    %52 = vector.shape_cast %51 : vector<1x1x8x8xbf16> to vector<8x8xbf16>
    %53 = vector.shape_cast %50 : vector<8x8xbf16> to vector<1x1x8x8xbf16>
    tpu.vector_store %arg6[%c0_35, %c2_36, %c0_37, %c0_38], %53 {strides = array<i32>} : memref<1x4x8x8xbf16, #tpu.memory_space<vmem>>, vector<1x1x8x8xbf16>,
    %54 = vector.extract_strided_slice %7 {offsets = [0, 80], sizes = [8, 8], strides = [1, 1]} : vector<8x96xf32> to vector<8x8xf32>
    %55 = arith.truncf %54 : vector<8x8xf32> to vector<8x8xbf16>
    %c0_39 = arith.constant 0 : index
    %c2_40 = arith.constant 2 : index
    %c0_41 = arith.constant 0 : index
    %c0_42 = arith.constant 0 : index
    %56 = vector.load %arg7[%c0_39, %c2_40, %c0_41, %c0_42] : memref<1x4x8x8xbf16, #tpu.memory_space<vmem>>, vector<1x1x8x8xbf16>
    %57 = vector.shape_cast %56 : vector<1x1x8x8xbf16> to vector<8x8xbf16>
    %58 = vector.shape_cast %55 : vector<8x8xbf16> to vector<1x1x8x8xbf16>
    tpu.vector_store %arg7[%c0_39, %c2_40, %c0_41, %c0_42], %58 {strides = array<i32>} : memref<1x4x8x8xbf16, #tpu.memory_space<vmem>>, vector<1x1x8x8xbf16>,
    %59 = vector.extract_strided_slice %7 {offsets = [0, 24], sizes = [8, 8], strides = [1, 1]} : vector<8x96xf32> to vector<8x8xf32>
    %cst_43 = arith.constant 0.353553385 : f32
    %60 = vector.broadcast %cst_43 : f32 to vector<8x8xf32>
    %61 = arith.mulf %59, %60 : vector<8x8xf32>
    %62 = arith.truncf %61 : vector<8x8xf32> to vector<8x8xbf16>
    %c0_44 = arith.constant 0 : index
    %c3 = arith.constant 3 : index
    %c0_45 = arith.constant 0 : index
    %c0_46 = arith.constant 0 : index
    %63 = vector.load %arg5[%c0_44, %c3, %c0_45, %c0_46] : memref<1x4x8x8xbf16, #tpu.memory_space<vmem>>, vector<1x1x8x8xbf16>
    %64 = vector.shape_cast %63 : vector<1x1x8x8xbf16> to vector<8x8xbf16>
    %65 = vector.shape_cast %62 : vector<8x8xbf16> to vector<1x1x8x8xbf16>
    tpu.vector_store %arg5[%c0_44, %c3, %c0_45, %c0_46], %65 {strides = array<i32>} : memref<1x4x8x8xbf16, #tpu.memory_space<vmem>>, vector<1x1x8x8xbf16>,
    %66 = vector.extract_strided_slice %7 {offsets = [0, 56], sizes = [8, 8], strides = [1, 1]} : vector<8x96xf32> to vector<8x8xf32>
    %67 = arith.truncf %66 : vector<8x8xf32> to vector<8x8xbf16>
    %c0_47 = arith.constant 0 : index
    %c3_48 = arith.constant 3 : index
    %c0_49 = arith.constant 0 : index
    %c0_50 = arith.constant 0 : index
    %68 = vector.load %arg6[%c0_47, %c3_48, %c0_49, %c0_50] : memref<1x4x8x8xbf16, #tpu.memory_space<vmem>>, vector<1x1x8x8xbf16>
    %69 = vector.shape_cast %68 : vector<1x1x8x8xbf16> to vector<8x8xbf16>
    %70 = vector.shape_cast %67 : vector<8x8xbf16> to vector<1x1x8x8xbf16>
    tpu.vector_store %arg6[%c0_47, %c3_48, %c0_49, %c0_50], %70 {strides = array<i32>} : memref<1x4x8x8xbf16, #tpu.memory_space<vmem>>, vector<1x1x8x8xbf16>,
    %71 = vector.extract_strided_slice %7 {offsets = [0, 88], sizes = [8, 8], strides = [1, 1]} : vector<8x96xf32> to vector<8x8xf32>
    %72 = arith.truncf %71 : vector<8x8xf32> to vector<8x8xbf16>
    %c0_51 = arith.constant 0 : index
    %c3_52 = arith.constant 3 : index
    %c0_53 = arith.constant 0 : index
    %c0_54 = arith.constant 0 : index
    %73 = vector.load %arg7[%c0_51, %c3_52, %c0_53, %c0_54] : memref<1x4x8x8xbf16, #tpu.memory_space<vmem>>, vector<1x1x8x8xbf16>
    %74 = vector.shape_cast %73 : vector<1x1x8x8xbf16> to vector<8x8xbf16>
    %75 = vector.shape_cast %72 : vector<8x8xbf16> to vector<1x1x8x8xbf16>
    tpu.vector_store %arg7[%c0_51, %c3_52, %c0_53, %c0_54], %75 {strides = array<i32>} : memref<1x4x8x8xbf16, #tpu.memory_space<vmem>>, vector<1x1x8x8xbf16>,
    return
  }
  func.func @transform_0(%arg0: i32, %arg1: i32) -> (i32, i32, i32) {
    %c0_i32 = arith.constant 0 : i32
    %c0_i32_0 = arith.constant 0 : i32
    return %arg0, %arg1, %c0_i32 : i32, i32, i32
  }
  func.func @transform_1(%arg0: i32, %arg1: i32) -> (i32, i32) {
    %c0_i32 = arith.constant 0 : i32
    %c0_i32_0 = arith.constant 0 : i32
    %c0_i32_1 = arith.constant 0 : i32
    return %c0_i32, %c0_i32_0 : i32, i32
  }
  func.func @transform_2(%arg0: i32, %arg1: i32) -> (i32, i32) {
    %c0_i32 = arith.constant 0 : i32
    %c0_i32_0 = arith.constant 0 : i32
    %c0_i32_1 = arith.constant 0 : i32
    return %c0_i32, %c0_i32_0 : i32, i32
  }
  func.func @transform_3(%arg0: i32, %arg1: i32) -> (i32, i32, i32, i32) {
    %c0_i32 = arith.constant 0 : i32
    %c0_i32_0 = arith.constant 0 : i32
    %c0_i32_1 = arith.constant 0 : i32
    return %arg0, %c0_i32, %arg1, %c0_i32_0 : i32, i32, i32, i32
  }
  func.func @transform_4(%arg0: i32, %arg1: i32) -> (i32, i32, i32, i32) {
    %c0_i32 = arith.constant 0 : i32
    %c0_i32_0 = arith.constant 0 : i32
    %c0_i32_1 = arith.constant 0 : i32
    return %arg0, %c0_i32, %arg1, %c0_i32_0 : i32, i32, i32, i32
  }
  func.func @transform_5(%arg0: i32, %arg1: i32) -> (i32, i32, i32, i32) {
    %c0_i32 = arith.constant 0 : i32
    %c0_i32_0 = arith.constant 0 : i32
    %c0_i32_1 = arith.constant 0 : i32
    return %arg0, %c0_i32, %arg1, %c0_i32_0 : i32, i32, i32, i32
  }
}

</mosaic_0001>

<bundles_post_ra>
// kernel: tpu_custom_call.1
= control target key start
LH: loop header
LB: loop body
LE: loop exit
PB: predicated region body
PF: predicated region fallthrough
CT: control target
= control target key end

     0   :  { %s1175_s0 = inlined_call_operand.vmem [shape: f32[2,8,128], index: 0, kind: input, shape index: {}]   ;;  %s1176_s1 = inlined_call_operand.vmem [shape: bf16[128,96], index: 1, kind: input, shape index: {}]   ;;  %s1177_s2 = inlined_call_operand.vmem [shape: f32[1,96], index: 2, kind: input, shape index: {}]   ;;  %s1178_s3 = inlined_call_operand.hbm [shape: bf16[2,4,8,8], index: 3, kind: output, shape index: {0}]   ;;  %s1179_s4 = inlined_call_operand.hbm [shape: bf16[2,4,8,8], index: 4, kind: output, shape index: {1}]   ;;  %s1180_s5 = inlined_call_operand.hbm [shape: bf16[2,4,8,8], index: 5, kind: output, shape index: {2}]  }
   0x1   :  { %1186 = sst [smem:[#allocation9_spill]] %s1175_s0 }
   0x2   :  { %11 = vsyncpa [#allocation3], 0 }
   0x3   :  { %13 = vsyncpa [#allocation3 + $0x1], 0 }
   0x4   :  { %14 = vsyncpa [#allocation5], 0 }
   0x5   :  { %16 = vsyncpa [#allocation5 + $0x1], 0  ;;  %s947_s18 = smov 0   ;;  %s949_s19 = smov 0  }
   0x6   :  { %s951_s20 = smov 0   ;;  %s953_s21 = smov 0  }
   0x7   :  { %s955_s22 = smov 0   ;;  %s957_s23 = smov 0  }
   0x8 LB: > { %s615_s24 = sadd.s32 4294967295, %s903_s23   ;;  %s1181_s25 = sadd.s32 4294967294, %s903_s23   ;;  %s903_s23 = sphi %s957_s23, %s22_s23   ;;  %s899_s22 = sphi %s955_s22, %s1198_s22   ;;  %s895_s21 = sphi %s953_s21, %s1197_s21   ;;  %s891_s20 = sphi %s951_s20, %s1196_s20   ;;  %s887_s19 = sphi %s949_s19, %s1195_s19   ;;  %s883_s18 = sphi %s947_s18, %s1194_s18  }
   0x9   : > { %s34_s26 = sadd.s32 1, %s899_s22  ;;  %s113_s27 = sadd.s32 1, %s891_s20 }
   0xa   : > { %p36_p0 = scmp.ge.s32.totalorder %s34_s26, 2  ;;  %p123_p1 = scmp.ne.s32.totalorder %s891_s20, %s887_s19 }
   0xb   : > { %p124_p2 = scmp.eq.s32.totalorder %s615_s24, 1  ;;  %p129_p3 = scmp.ne.s32.totalorder %s887_s19, %s883_s18 }
   0xc   : > { %s1200_s26 = smov (%p36_p0, %s34_s26), 0  ;;  %p130_p5 = scmp.eq.s32.totalorder %s1181_s25, 1 }
   0xd   : > { %p989_p4 = por %p124_p2, %p123_p1  ;;  %s108_s29 = ssub.s32 %s899_s22, %s1200_s26 }
   0xe   : > { %p619_p6 = scmp.ge.s32.totalorder %s903_s23, 1  ;;  %p111_p7 = scmp.eq.s32.totalorder %s108_s29, 0 }
   0xf   : > { %p998_p8 = por %p130_p5, %p129_p3  ;;  %p220_p9 = scmp.lt.s32.totalorder %s903_s23, 3 }
  0x10   : > { %s1004_s6 = scalar_select %p111_p7, %s891_s20, %s113_s27  }
  0x11   : > { %p221_p10 = pnand %p619_p6, %p220_p9 }
  0x12   : > { %p260_p11 = scmp.lt.s32.totalorder (!%p221_p10), %s895_s21, 1  ;;  %s1189_s0 = sld [smem:[#allocation9_spill]] (!%p221_p10) }
  0x13   : > { %224 = sbr.rel (%p221_p10) target bundleno = 342 (0x156), region = 32  ;;  %s1184_s29 = smov (!%p221_p10), 64  }
  0x14   : > { %s907_s8 = smov (!%p221_p10), 96   ;;  %s908_s10 = smov (!%p221_p10), 72  }
  0x15   : > { %s909_s11 = smov (!%p221_p10), 120   ;;  %s911_s13 = smov (!%p221_p10), 112  }
  0x16   : > { %s912_s14 = smov (!%p221_p10), 48   ;;  %s913_s15 = smov (!%p221_p10), 56  }
  0x17   : > { %s914_s16 = smov (!%p221_p10), 40  }
  0x18   : > { %v683_v0 = vld [vmem:[%s1176_s1 + $0x38] sm:$0xff]  ;;  %v682_v1 = vld [vmem:[%s1176_s1 + $0x30] sm:$0xff]  ;;  %v681_v2 = vld [vmem:[%s1176_s1 + $0x28] sm:$0xff]  ;;  %s261_s17 = scalar_select %p260_p11, %s895_s21, 1  ;;  %vm352_vm0 = vcmask 60416  }
  0x19   : > { %337 = vmatpush.bf16.msra.mxu0 %v683_v0  ;;  %v680_v3 = vld [vmem:[%s1176_s1 + $0x20] sm:$0xff]  ;;  %v679_v4 = vld [vmem:[%s1176_s1 + $0x18] sm:$0xff]  ;;  %v678_v5 = vld [vmem:[%s1176_s1 + $0x10] sm:$0xff] }
  0x1a   : > { %s623_s7 = sshll.u32 %s261_s17, 3  ;;  %v677_v6 = vld [vmem:[%s1176_s1 + $0x8] sm:$0xff]  ;;  %v676_v7 = vld [vmem:[%s1176_s1] sm:$0xff]  ;;  %s1182_s17 = sand.u32 1, %s887_s19  }
  0x1b   : > { %s266_s12 = scalar_lea.vmem %s1189_s0, %s623_s7  ;;  %v764_v10 = vld [vmem:[%s1177_s2] ss:$0 sm:$0xff]  ;;  %s1041_s27 = sshll.u32 %s1182_s17, 4 }
  0x1c   : > { %v267_v8 = vld [vmem:[%s266_s12] sm:$0xff]  ;;  %s906_s7 = smov 80   ;;  %s1045_s9 = scalar_lea.vmem [#allocation2], %s1041_s27 }
  0x1d   : > { %338 = vmatpush.bf16.msra.mxu0 %v682_v1  ;;  %v268_v9 = vpack.c.bf16 %v267_v8, %v267_v8  ;;  %s910_s12 = smov 88  }
  0x21   : > { %339 = vmatpush.bf16.msra.mxu0 %v681_v2 }
  0x25   : > { %340 = vmatpush.bf16.msra.mxu0 %v680_v3 }
  0x29   : > { %341 = vmatpush.bf16.msra.mxu0 %v679_v4 }
  0x2d   : > { %342 = vmatpush.bf16.msra.mxu0 %v678_v5 }
  0x31   : > { %343 = vmatpush.bf16.msra.mxu0 %v677_v6 }
  0x35   : > { %344 = vmatpush.bf16.msra.mxu0 %v676_v7 }
  0x38   : > { %345 = vmatmul.bf16.vlgmr.msra.gmra.mxu0 %v268_v9 }
  0xb5   : > { %v346_v11 = vpop.f32.mrf.mxu0 }
  0xb6   : > { %v347_v12 = vadd.f32 %v764_v10, %v346_v11 }
  0xb8   : > { %v350_v13 = vmul.f32 0.35355338, %v347_v12  ;;  %v354_v14 = vpack.c.bf16 %v347_v12, %v347_v12 }
  0xba   : > { %v351_v15 = vpack.c.bf16 %v350_v13, %v350_v13  ;;  %360 = vrot.lane.b32.xlu2 %v354_v14, %s1184_s29  ;;  %385 = vrot.lane.b32.xlu1 %v354_v14, %s906_s7  ;;  %s915_s7 = smov 104  }
  0xbb   : > { %356 = vrot.lane.b32.xlu0 %v354_v14, %s907_s8  ;;  %s1050_s8 = scalar_lea.vmem [#allocation6], %s1041_s27 }
  0xbc   : > { %353 = vst.msk [vmem:[%s1045_s9] sm:$0xf] %vm352_vm0, %v351_v15 }
  0xbd   : > { %v348_v16 = vpop.f32.mrf.mxu0 }
  0xc2   : > { %400 = vrot.lane.b32.xlu1 %v354_v14, %s908_s10  ;;  %365 = vrot.lane.b32.xlu2 %v351_v15, %s909_s11  ;;  %s1059_s10 = sshll.u32 %s895_s21, 4  ;;  %s252_s11 = scalar_lea.vmem [#allocation4], %s1041_s27 }
  0xc3   : > { %370 = vrot.lane.b32.xlu0 %v354_v14, %s910_s12 }
  0xca   : > { %380 = vrot.lane.b32.xlu1 %v351_v15, %s911_s13  ;;  %390 = vrot.lane.b32.xlu2 %v354_v14, %s912_s14  ;;  %s451_s14 = scalar_lea.hbm %s1179_s4, %s1059_s10 }
  0xcb   : > { %375 = vrot.lane.b32.xlu0 %v354_v14, %s913_s15  ;;  %s452_s15 = sshll.u32 %s252_s11, 4  ;;  %s454_s21 = sshll.u32 %s451_s14, 4  ;;  %s453_s15 = int_to_ptr.vmem [resolvable:$true] %s452_s15  ;;  %s455_s21 = int_to_ptr.hbm [resolvable:$true] %s454_s21 }
  0xcc   : > { %s785_s14 = scalar_lea.hbm %s1179_s4, 32 }
  0xd2   : > { %405 = vrot.lane.b32.xlu1 %v354_v14, %s914_s16  ;;  %s1070_s16 = sand.u32 1, %s615_s24  }
  0xd3   : > { %395 = vrot.lane.b32.xlu0 %v351_v15, %s915_s7  ;;  %s1183_s27 = scalar_lea.sflag [#allocation5], %s1070_s16  ;;  %s779_s7 = sshra.s32 %s455_s21, 4  ;;  %s780_s7 = int_to_ptr.hbm [resolvable:$true] %s779_s7 }
  0xd4   : > { %s781_s12 = scalar_lea.hbm %s780_s7, 16  ;;  %p786_p1 = scmp.lt.s32.totalorder %s780_s7, %s1179_s4 }
  0xd5   : > { %p782_p12 = scmp.ne.s32.totalorder %s780_s7, %s781_s12  ;;  %p787_p2 = scmp.lt.s32.totalorder %s785_s14, %s781_s12 }
  0xd7   : > { %p783_p13 = pnand %p782_p12, %p989_p4  ;;  %p788_p3 = por %p787_p2, %p786_p1 }
  0xd9   : > { %p784_p0 = pneg %p783_p13 }
  0xdb   : > { %p789_p5 = pnand %p788_p3, %p784_p0 }
 0x114   : > { %v361_v17 = vpop.permute.xlu2 %360 }
 0x115   : > { %363 = vst.msk [vmem:[%s1050_s8] sm:$0xf] %vm352_vm0, %v361_v17 }
 0x11c   : > { %v366_v18 = vpop.permute.xlu2 %365 }
 0x11d   : > { %656 = vst.msk [vmem:[%s1045_s9 + $0x4] sm:$0xf] %vm352_vm0, %v366_v18 }
 0x124   : > { %v391_v19 = vpop.permute.xlu2 %390 }
 0x125   : > { %661 = vst.msk [vmem:[%s1050_s8 + $0x8] sm:$0xf] %vm352_vm0, %v391_v19 }
 0x12c   : > { %v386_v20 = vpop.permute.xlu1 %385 }
 0x12d   : > { %660 = vst.msk [vmem:[%s252_s11 + $0x8] sm:$0xf] %vm352_vm0, %v386_v20  ;;  %v357_v21 = vpop.permute.xlu0 %356 }
 0x12e   : > { %359 = vst.msk [vmem:[%s252_s11] sm:$0xf] %vm352_vm0, %v357_v21 }
 0x134   : > { %v401_v22 = vpop.permute.xlu1 %400 }
 0x135   : > { %663 = vst.msk [vmem:[%s252_s11 + $0xc] sm:$0xf] %vm352_vm0, %v401_v22  ;;  %v371_v23 = vpop.permute.xlu0 %370 }
 0x136   : > { %657 = vst.msk [vmem:[%s252_s11 + $0x4] sm:$0xf] %vm352_vm0, %v371_v23 }
 0x137   : > { %792 = shalt.err (!%p789_p5)
}
 0x138   : > { %s916_s11 = smov 4   ;;  %s433_s7 = scalar_lea.hbm %s1178_s3, %s1059_s10 }
 0x139   : > { %688 = dma.vmem_to_hbm [thread:$0]  (%p989_p4), %s453_s15, 256, %s455_s21, %s1183_s27, %s1184_s29, %s1184_s29, %s916_s11  }
 0x13a   : > { %s469_s13 = scalar_lea.hbm %s1180_s5, %s1059_s10  ;;  %s434_s14 = sshll.u32 %s1045_s9, 4  ;;  %s435_s14 = int_to_ptr.vmem [resolvable:$true] %s434_s14 }
 0x13b   : > { %s1103_s0 = sshll.u32 %s433_s7, 4  ;;  %s470_s15 = sshll.u32 %s1050_s8, 4  ;;  %s437_s0 = int_to_ptr.hbm [resolvable:$true] %s1103_s0  ;;  %s1109_s15 = int_to_ptr.vmem [resolvable:$true] %s470_s15 }
 0x13c   : > { %v381_v24 = vpop.permute.xlu1 %380  ;;  %s1106_s21 = sshll.u32 %s469_s13, 4  ;;  %s1190_s10 = sand.u32 1, %s887_s19   ;;  %s473_s21 = int_to_ptr.hbm [resolvable:$true] %s1106_s21 }
 0x13d   : > { %v376_v25 = vpop.permute.xlu0 %375  ;;  %659 = vst.msk [vmem:[%s1045_s9 + $0x8] sm:$0xf] %vm352_vm0, %v381_v24  ;;  %s411_s25 = scalar_lea.sflag [#allocation3], %s1190_s10  ;;  %s807_s17 = sshra.s32 %s437_s0, 4  ;;  %s808_s17 = int_to_ptr.hbm [resolvable:$true] %s807_s17 }
 0x13e   : > { %658 = vst.msk [vmem:[%s1050_s8 + $0x4] sm:$0xf] %vm352_vm0, %v376_v25  ;;  %s809_s7 = scalar_lea.hbm %s808_s17, 16  ;;  %s813_s13 = scalar_lea.hbm %s1178_s3, 32 }
 0x13f   : > { %p810_p6 = scmp.ne.s32.totalorder %s808_s17, %s809_s7  ;;  %p814_p10 = scmp.lt.s32.totalorder %s808_s17, %s1178_s3 }
 0x140   : > { %p815_p11 = scmp.lt.s32.totalorder %s813_s13, %s809_s7 }
 0x141   : > { %p811_p7 = pnand %p810_p6, %p989_p4 }
 0x142   : > { %p816_p12 = por %p815_p11, %p814_p10 }
 0x143   : > { %p812_p9 = pneg %p811_p7 }
 0x144   : > { %v406_v26 = vpop.permute.xlu1 %405 }
 0x145   : > { %v396_v27 = vpop.permute.xlu0 %395  ;;  %664 = vst.msk [vmem:[%s1050_s8 + $0xc] sm:$0xf] %vm352_vm0, %v406_v26  ;;  %p817_p13 = pnand %p816_p12, %p812_p9 }
 0x146   : > { %662 = vst.msk [vmem:[%s1045_s9 + $0xc] sm:$0xf] %vm352_vm0, %v396_v27 }
 0x147   : > { %820 = shalt.err (!%p817_p13)
}
 0x148   : > { %s1191_s9 = smov 64   ;;  %s835_s8 = sshra.s32 %s473_s21, 4  ;;  %s836_s8 = int_to_ptr.hbm [resolvable:$true] %s835_s8 }
 0x149   : > { %687 = dma.vmem_to_hbm [thread:$0]  (%p989_p4), %s435_s14, 256, %s437_s0, %s411_s25, %s1191_s9, %s1191_s9, %s916_s11  }
 0x14a   : > { %s837_s10 = scalar_lea.hbm %s836_s8, 16  ;;  %s841_s17 = scalar_lea.hbm %s1180_s5, 32 }
 0x14b   : > { %p838_p0 = scmp.ne.s32.totalorder %s836_s8, %s837_s10  ;;  %p842_p3 = scmp.lt.s32.totalorder %s836_s8, %s1180_s5 }
 0x14c   : > { %p843_p5 = scmp.lt.s32.totalorder %s841_s17, %s837_s10 }
 0x14d   : > { %p839_p1 = pnand %p838_p0, %p989_p4 }
 0x14e   : > { %p844_p6 = por %p843_p5, %p842_p3 }
 0x14f   : > { %p840_p2 = pneg %p839_p1 }
 0x151   : > { %p845_p7 = pnand %p844_p6, %p840_p2 }
 0x153   : > { %848 = shalt.err (!%p845_p7)
}
 0x154   : > { %s1192_s0 = scalar_lea.sflag [#allocation5], %s1070_s16 }
 0x155   : > { %689 = dma.vmem_to_hbm [thread:$0]  (%p989_p4), %s1109_s15, 256, %s473_s21, %s1192_s0, %s1191_s9, %s1191_s9, %s916_s11  }
 0x156 PF: > { %p703_p9 = scmp.ge.s32.totalorder %s903_s23, 2  ;;  %s487_s14 = sand.u32 1, %s883_s18  }
 0x157   : > { %s488_s25 = scalar_lea.sflag [#allocation3], %s487_s14 }
 0x158   : > { %p694_p10 = pnand %p703_p9, %p998_p8 }
 0x15a   : > { %p695_p11 = pneg %p694_p10 }
 0x15c   : > { %874 = dma.done.wait (%p695_p11), %s488_s25, 256  }
 0x15d   : > { %876 = vsyncadd (%p695_p11), %s488_s25, 4294967040  ;;  %s1193_s28 = sadd.s32 4294967294, %s903_s23  }
 0x15e   : > { %s497_s24 = sand.u32 1, %s1193_s28  }
 0x15f   : > { %s498_s16 = scalar_lea.sflag [#allocation5], %s497_s24 }
 0x160   : > { %878 = dma.done.wait (%p695_p11), %s498_s16, 512  }
 0x161   : > { %880 = vsyncadd (%p695_p11), %s498_s16, 4294966784  ;;  %s22_s23 = sadd.s32 1, %s903_s23   ;;  %s1194_s18 = smov %s887_s19 }
 0x162   : > { %p19_p4 = scmp.ge.s32.totalorder %s22_s23, 4   ;;  %s1195_s19 = smov %s891_s20 }
 0x163   : > { %s1196_s20 = smov %s1004_s6  ;;  %s1197_s21 = smov %s899_s22 }
 0x164   : > { %s1198_s22 = smov %s1200_s26  ;;  %21 = sbr.rel (!%p19_p4) target bundleno = 8 (0x8), region = 108 }
 0x169   :  { %514 = vsyncpa [#allocation3], 1 }
 0x16a   :  { %516 = vsyncpa [#allocation3 + $0x1], 1 }
 0x16b   :  { %517 = vsyncpa [#allocation5], 1 }
 0x16c   :  { %519 = vsyncpa [#allocation5 + $0x1], 1 }

</bundles_post_ra>
